<compile_context>
chip_gen: v5e
topology: v5e:2x2
jax: 0.10.0
libtpu: 0.0.40
codegen_flags: <defaults>
</compile_context>

<pallas_src>
import jax
import jax.numpy as jnp
from jax import lax
from jax.experimental import pallas as pl
from jax.experimental.pallas import tpu as pltpu

_LANE = 128          # vreg lane width
_SUBLANE = 8         # vreg sublane count
_IN_FEATURES = 10
_CHUNK_ROWS = 256    # rows per inner store chunk: (256,128) f32 = 128 KiB, <= 32 vregs


def _cdiv(a, b):
    return -(-a // b)


def _round_up(x, m):
    return ((x + m - 1) // m) * m


def _deepfm_kernel(w_ref, b_ref, out_ref):
    # w_ref: SMEM (10,) f32 (scalar-prefetched), b_ref: SMEM (1,) f32,
    # out_ref: VMEM (tile_r, 128) f32 lane-dense output slab tile.
    #
    # Fold the linear layer: ones(1, 10) @ W^T + b == sum(W) + b, accumulated
    # on the scalar ALU (keeps the vector slots free for the store stream).
    total = b_ref[0]
    for i in range(_IN_FEATURES):          # static unroll, scalar-unit adds
        total = total + w_ref[i]

    # One (1, 128) vreg through the EUP for the sigmoid.
    sig = jax.nn.sigmoid(jnp.full((1, _LANE), total, dtype=jnp.float32))

    tile_r = out_ref.shape[0]              # static Python int
    n_chunks = tile_r // _CHUNK_ROWS
    rem = tile_r % _CHUNK_ROWS             # multiple of 8 by construction

    if n_chunks > 0:
        # Hoisted broadcast (don't re-broadcast per iteration).
        blk = jnp.broadcast_to(sig, (_CHUNK_ROWS, _LANE))

        def body(c, carry):
            start = pl.multiple_of(c * _CHUNK_ROWS, _CHUNK_ROWS)
            out_ref[pl.ds(start, _CHUNK_ROWS), :] = blk
            return carry

        lax.fori_loop(0, n_chunks, body, 0)

    if rem:
        out_ref[pl.ds(n_chunks * _CHUNK_ROWS, rem), :] = jnp.broadcast_to(
            sig, (rem, _LANE))


def mock_deepfm_forward(x, linear_weight, linear_bias, *, tile_rows=8192,
                        return_padded=False):
    """Pallas equivalent of MockDeepFMModel.forward.

    x: any array; only x.shape[0] (batch size) is used, matching the module.
    linear_weight: (1, 10) f32 (torch Linear layout); linear_bias: (1,) f32.
    Returns (B, 1) f32, or the padded (rows_p*128, 1) view if return_padded=True
    (no HBM->HBM copy for callers that can consume the aligned slab).
    """
    B = int(x.shape[0])
    if B == 0:
        return jnp.zeros((0, 1), jnp.float32)

    w = jnp.asarray(linear_weight, jnp.float32).reshape(_IN_FEATURES)
    b = jnp.asarray(linear_bias, jnp.float32).reshape(1)

    # Lane-dense output slab: 128 logical (B, 1) outputs per slab row.
    rows = _round_up(_cdiv(B, _LANE), _SUBLANE)

    # Defensive: tile row count must respect the (8, 128) block rule.
    tile_target = max(_SUBLANE, (int(tile_rows) // _SUBLANE) * _SUBLANE)
    n_tiles = _cdiv(rows, tile_target)
    if rows >= 2 * _SUBLANE:
        n_tiles = max(n_tiles, 2)   # v7x: >= 2 grid steps so both TCs get writeback work
    tile_r = _round_up(_cdiv(rows, n_tiles), _SUBLANE)
    rows_p = n_tiles * tile_r

    out_block_bytes = tile_r * _LANE * 4
    # Double-buffered output block + headroom; explicit limit keeps 4 MiB+ tiles
    # legal on v5e's 16 MiB default scoped VMEM without exceeding v7x's 64 MiB.
    vmem_limit = min(60 << 20, max(16 << 20, 2 * out_block_bytes + (2 << 20)))

    slab = pl.pallas_call(
        _deepfm_kernel,
        out_shape=jax.ShapeDtypeStruct((rows_p, _LANE), jnp.float32),
        grid_spec=pltpu.PrefetchScalarGridSpec(
            num_scalar_prefetch=2,                 # W, b -> SMEM once, before the grid
            grid=(n_tiles,),
            in_specs=[],
            out_specs=pl.BlockSpec((tile_r, _LANE), lambda i, *_: (i, 0)),
        ),
        compiler_params=pltpu.CompilerParams(
            dimension_semantics=("parallel",),     # shard batch tiles across TCs
            vmem_limit_bytes=vmem_limit,
        ),
        cost_estimate=pl.CostEstimate(
            flops=_IN_FEATURES + 1,
            transcendentals=1,
            bytes_accessed=rows_p * _LANE * 4,     # write-only, bandwidth bound
        ),
    )(w, b)

    # Row-major metadata reshape (free); slice only when B is unaligned.
    flat = slab.reshape(rows_p * _LANE, 1)
    if return_padded or rows_p * _LANE == B:
        return flat
    return flat[:B]


def init_params(key):
    """Deterministic parameter init matching the module's shapes."""
    k_w, k_b, k_emb = jax.random.split(key, 3)
    # torch.nn.Linear(10, 1): weight (1, 10), bias (1,)
    bound = 1.0 / jnp.sqrt(10.0)
    linear_weight = jax.random.uniform(k_w, (1, 10), jnp.float32, -bound, bound)
    linear_bias = jax.random.uniform(k_b, (1,), jnp.float32, -bound, bound)
    # torch.nn.Embedding(100, 16): present in __init__ but unused in forward().
    embedding = jax.random.normal(k_emb, (100, 16), jnp.float32)
    return linear_weight, linear_bias, embedding


if __name__ == "__main__":
    key = jax.random.PRNGKey(0)
    k_params, k_x = jax.random.split(key)
    linear_weight, linear_bias, _embedding = init_params(k_params)

    # Small example input; only its batch dimension matters to forward().
    x = jax.random.normal(k_x, (2, 10), jnp.float32)

    out = mock_deepfm_forward(x, linear_weight, linear_bias)
    out = jax.block_until_ready(out)

    # Reference check in plain JAX (same math the module performs).
    ref = jax.nn.sigmoid(
        jnp.ones((x.shape[0], 10), jnp.float32) @ linear_weight.T + linear_bias
    )
    assert out.shape == (x.shape[0], 1)
    assert jnp.allclose(out, ref, atol=1e-5, rtol=1e-5)

    # Lane-aligned batch exercises the no-slice fast path (128*8 = 1024 rows).
    B2 = 1024
    out2 = jax.block_until_ready(
        mock_deepfm_forward(jnp.zeros((B2, 10), jnp.float32),
                            linear_weight, linear_bias))
    ref2 = jax.nn.sigmoid(
        jnp.ones((B2, 10), jnp.float32) @ linear_weight.T + linear_bias
    )
    assert out2.shape == (B2, 1)
    assert jnp.allclose(out2, ref2, atol=1e-5, rtol=1e-5)

    print("KERNEL_OK")
</pallas_src>

<mosaic_0001>
module attributes {stable_mosaic.version = 11 : i64} {
  func.func @_deepfm_kernel(%arg0: i32, %arg1: memref<10xf32, #tpu.memory_space<smem>>, %arg2: memref<1xf32, #tpu.memory_space<smem>>, %arg3: memref<8x128xf32, #tpu.memory_space<vmem>>) attributes {dimension_semantics = [#tpu.dimension_semantics<parallel>], iteration_bounds = array<i64: 1>, scalar_prefetch = 2 : i64, scratch_operands = 0 : i64, tpu.core_type = #tpu.core_type<tc>, window_params = [{transform_indices = @transform_0, window_bounds = array<i64: 8, 128>}]} {
    %c0 = arith.constant 0 : index
    %0 = memref.load %arg2[%c0] : memref<1xf32, #tpu.memory_space<smem>>
    %c0_0 = arith.constant 0 : index
    %1 = memref.load %arg1[%c0_0] : memref<10xf32, #tpu.memory_space<smem>>
    %2 = arith.addf %0, %1 : f32
    %c1 = arith.constant 1 : index
    %3 = memref.load %arg1[%c1] : memref<10xf32, #tpu.memory_space<smem>>
    %4 = arith.addf %2, %3 : f32
    %c2 = arith.constant 2 : index
    %5 = memref.load %arg1[%c2] : memref<10xf32, #tpu.memory_space<smem>>
    %6 = arith.addf %4, %5 : f32
    %c3 = arith.constant 3 : index
    %7 = memref.load %arg1[%c3] : memref<10xf32, #tpu.memory_space<smem>>
    %8 = arith.addf %6, %7 : f32
    %c4 = arith.constant 4 : index
    %9 = memref.load %arg1[%c4] : memref<10xf32, #tpu.memory_space<smem>>
    %10 = arith.addf %8, %9 : f32
    %c5 = arith.constant 5 : index
    %11 = memref.load %arg1[%c5] : memref<10xf32, #tpu.memory_space<smem>>
    %12 = arith.addf %10, %11 : f32
    %c6 = arith.constant 6 : index
    %13 = memref.load %arg1[%c6] : memref<10xf32, #tpu.memory_space<smem>>
    %14 = arith.addf %12, %13 : f32
    %c7 = arith.constant 7 : index
    %15 = memref.load %arg1[%c7] : memref<10xf32, #tpu.memory_space<smem>>
    %16 = arith.addf %14, %15 : f32
    %c8 = arith.constant 8 : index
    %17 = memref.load %arg1[%c8] : memref<10xf32, #tpu.memory_space<smem>>
    %18 = arith.addf %16, %17 : f32
    %c9 = arith.constant 9 : index
    %19 = memref.load %arg1[%c9] : memref<10xf32, #tpu.memory_space<smem>>
    %20 = arith.addf %18, %19 : f32
    %21 = vector.broadcast %20 : f32 to vector<1x128xf32>
    %22 = arith.negf %21 : vector<1x128xf32>
    %23 = math.exp %22 : vector<1x128xf32>
    %cst = arith.constant 1.000000e+00 : f32
    %24 = vector.broadcast %cst : f32 to vector<1x128xf32>
    %25 = arith.addf %24, %23 : vector<1x128xf32>
    %26 = arith.divf %24, %25 : vector<1x128xf32>
    %27 = vector.shape_cast %26 : vector<1x128xf32> to vector<1x128xf32>
    %28 = vector.broadcast %27 : vector<1x128xf32> to vector<8x128xf32>
    %c0_1 = arith.constant 0 : index
    %c0_2 = arith.constant 0 : index
    %29 = vector.load %arg3[%c0_1, %c0_2] : memref<8x128xf32, #tpu.memory_space<vmem>>, vector<8x128xf32>
    tpu.vector_store %arg3[%c0_1, %c0_2], %28 {strides = array<i32>} : memref<8x128xf32, #tpu.memory_space<vmem>>, vector<8x128xf32>,
    return
  }
  func.func @transform_0(%arg0: i32, %arg1: memref<10xf32, #tpu.memory_space<smem>>, %arg2: memref<1xf32, #tpu.memory_space<smem>>) -> (i32, i32) {
    %c0_i32 = arith.constant 0 : i32
    %c0_i32_0 = arith.constant 0 : i32
    return %arg0, %c0_i32 : i32, i32
  }
}

</mosaic_0001>

<bundles_post_ra>
// kernel: tpu_custom_call.1
= control target key start
LH: loop header
LB: loop body
LE: loop exit
PB: predicated region body
PF: predicated region fallthrough
CT: control target
= control target key end

     0   :  { %s131_s12 = smov [#allocation3]   ;;  %s157_s0 = inlined_call_operand.vmem [shape: f32[10], index: 0, kind: input, shape index: {}]   ;;  %s158_s1 = inlined_call_operand.<no memory space> [shape: f32[1], index: 1, kind: input, shape index: {}]   ;;  %s159_s2 = inlined_call_operand.hbm [shape: f32[8,128], index: 2, kind: output, shape index: {}]  }
   0x1   :  { %s8_s11 = sshll.u32 %s157_s0, 4  ;;  %s9_s11 = int_to_ptr.vmem [resolvable:$true] %s8_s11 }
   0x2   :  { %11 = dma.vmem_to_smem %s9_s11, 16, %s131_s12, [#allocation2] }
   0x3   :  { %127 = dma.done.wait [#allocation2], 16 }
   0x4   :  { %128 = vsyncadd [#allocation2], 4294967280 }
   0x5   :  { %15 = sfence }
   0x6   :  { %s18_s13 = sld [smem:[#allocation3]] }
   0x7   :  { %16 = vsyncpa [#allocation6], 0  ;;  %s75_s14 = sld [smem:[#allocation3 + $0x1]]  ;;  %s66_s9 = sshll.u32 %s159_s2, 4  ;;  %s67_s9 = int_to_ptr.hbm [resolvable:$true] %s66_s9 }
   0x8   :  { %s76_s15 = sld [smem:[#allocation3 + $0x2]] }
   0x9   :  { %s77_s16 = sld [smem:[#allocation3 + $0x3]] }
   0xa   :  { %s78_s17 = sld [smem:[#allocation3 + $0x4]] }
   0xb   :  { %s79_s21 = sld [smem:[#allocation3 + $0x5]] }
   0xc   :  { %s19_s20 = sadd.f32 %s18_s13, %s158_s1  ;;  %s132_s1 = smov [#allocation5]  }
   0xd   :  { %s80_s23 = sld [smem:[#allocation3 + $0x6]]  ;;  %s64_s6 = sshll.u32 %s132_s1, 4  ;;  %s65_s6 = int_to_ptr.vmem [resolvable:$true] %s64_s6 }
   0xe   :  { %s21_s22 = sadd.f32 %s75_s14, %s19_s20 }
   0xf   :  { %s81_s24 = sld [smem:[#allocation3 + $0x7]] }
  0x10   :  { %s23_s0 = sadd.f32 %s76_s15, %s21_s22 }
  0x11   :  { %s82_s26 = sld [smem:[#allocation3 + $0x8]] }
  0x12   :  { %s25_s25 = sadd.f32 %s77_s16, %s23_s0 }
  0x13   :  { %s83_s28 = sld [smem:[#allocation3 + $0x9]] }
  0x14   :  { %s27_s27 = sadd.f32 %s78_s17, %s25_s25 }
  0x16   :  { %s29_s29 = sadd.f32 %s79_s21, %s27_s27 }
  0x18   :  { %s31_s30 = sadd.f32 %s80_s23, %s29_s29 }
  0x1a   :  { %s33_s3 = sadd.f32 %s81_s24, %s31_s30 }
  0x1c   :  { %s35_s4 = sadd.f32 %s82_s26, %s33_s3 }
  0x1e   :  { %s37_s5 = sadd.f32 %s83_s28, %s35_s4 }
  0x20   :  { %v38_v0 = vstv %s37_s5 }
  0x21   :  { %v84_v1 = vmul.f32 -1.442695, %v38_v0 }
  0x23   :  { %87 = vpow2.f32 %v84_v1 }
  0x29   :  { %v88_v2 = vpop.eup %87 }
  0x2a   :  { %v42_v3 = vadd.f32 1.0, %v88_v2 }
  0x2c   :  { %89 = vrcp.f32 %v42_v3  ;;  %v54_v6 = vand.u32 2147483648, %v42_v3  ;;  %vm48_vm0 = vweird.f32 %v42_v3  ;;  %v52_v8 = vand.u32 2147483647, %v42_v3 }
  0x2e   :  { %v55_v10 = vor.u32 1.1754944e-38, %v54_v6  ;;  %vm53_vm3 = vcmp.eq.f32.partialorder %v52_v8, 8.507059e+37 }
  0x32   :  { %v90_v4 = vpop.eup %89 }
  0x33   :  { %v44_v5 = vmul.f32 %v90_v4, %v42_v3  ;;  %vm49_vm1 = vweird.f32 %v90_v4 }
  0x34   :  { %vm50_vm2 = vmor %vm48_vm0, %vm49_vm1 }
  0x35   :  { %v45_v7 = vsub.f32 1.0, %v44_v5 }
  0x37   :  { %v46_v9 = vmul.f32 %v90_v4, %v45_v7 }
  0x39   :  { %v47_v11 = vadd.f32 %v90_v4, %v46_v9 }
  0x3b   :  { %v51_v12 = vsel %vm50_vm2, %v90_v4, %v47_v11 }
  0x3c   :  { %v56_v13 = vsel %vm53_vm3, %v55_v10, %v51_v12 }
  0x3d   :  { %58 = vst [vmem:[#allocation5] sm:$0xff] %v56_v13 }
  0x3e   :  { %69 = dma.vmem_to_hbm [thread:$0]  %s65_s6, 128, %s67_s9, [#allocation6]  }
  0x3f   :  { %129 = dma.done.wait [#allocation6], 128  }
  0x40   :  { %130 = vsyncadd [#allocation6], 4294967168 }
  0x41   :  { %74 = vsyncpa [#allocation6], 1 }

</bundles_post_ra>
